<compile_context>
chip_gen: v5e
topology: v5e:2x2
jax: 0.10.0
libtpu: 0.0.40
codegen_flags: <defaults>
</compile_context>

<pallas_src>
import jax
import jax.numpy as jnp
from jax.experimental import pallas as pl
from jax.experimental.pallas import tpu as pltpu  # noqa: F401


# ----------------------------- Pallas kernel ------------------------------

def _gcn_fused_kernel(adj_ref, pool_ref, x_ref, *wb_and_out):
    """Fused: h = x; repeat 5x: h = relu(A_hat @ h @ W + b); out = P @ h."""
    out_ref = wb_and_out[-1]
    wb_refs = wb_and_out[:-1]                     # (w1, b1, ..., w5, b5)

    adj = adj_ref[...]                            # bf16 [Np, Np]
    h = x_ref[...]                                # bf16 [Np, C0p]

    for li in range(0, len(wb_refs), 2):
        w_ref, b_ref = wb_refs[li], wb_refs[li + 1]
        # aggregate first (narrow width), then transform: fewer MXU FLOPs since
        # c_in <= c_out for every layer.
        agg = jnp.dot(adj, h, preferred_element_type=jnp.float32)          # f32
        z = jnp.dot(agg.astype(jnp.bfloat16), w_ref[...],
                    preferred_element_type=jnp.float32)                    # f32
        # bias + ReLU epilogue in f32 (VPU), then back to bf16 for next MXU op.
        h = jnp.maximum(z + b_ref[...], 0.0).astype(jnp.bfloat16)

    # global mean pool: out[g] = mean of rows of h belonging to graph g.
    out_ref[...] = jnp.dot(pool_ref[...], h, preferred_element_type=jnp.float32)


def gcn_fused(adj_p, pool_p, x_p, padded_params):
    """Single pallas_call over full-array blocks (everything resident in VMEM)."""
    n_pad = adj_p.shape[0]
    g = pool_p.shape[0]
    c_final = padded_params[-1][0].shape[1]

    flat = []
    for w_p, b_p in padded_params:
        flat.extend([w_p, b_p])

    # Advisory cost estimate so XLA schedules adjacency/pool construction around us.
    flops = 0
    bytes_accessed = adj_p.size * 2 + pool_p.size * 2 + x_p.size * 2
    c_in = x_p.shape[1]
    for w_p, b_p in padded_params:
        c_out = w_p.shape[1]
        flops += 2 * n_pad * n_pad * c_in + 2 * n_pad * c_in * c_out
        bytes_accessed += w_p.size * 2 + b_p.size * 4
        c_in = c_out
    flops += 2 * g * n_pad * c_final
    bytes_accessed += g * c_final * 4

    in_specs = [pl.BlockSpec(a.shape, lambda: (0, 0))
                for a in (adj_p, pool_p, x_p, *flat)]

    return pl.pallas_call(
        _gcn_fused_kernel,
        out_shape=jax.ShapeDtypeStruct((g, c_final), jnp.float32),
        in_specs=in_specs,
        out_specs=pl.BlockSpec((g, c_final), lambda: (0, 0)),
        cost_estimate=pl.CostEstimate(flops=flops, transcendentals=0,
                                      bytes_accessed=bytes_accessed),
    )(adj_p, pool_p, x_p, *flat)


# ------------------------------- JAX glue -----------------------------------

def _round_up(v, m):
    return ((v + m - 1) // m) * m


def build_norm_adj(edge_index, num_nodes):
    """Dense GCN-normalized adjacency: D^{-1/2} (A + I_remaining) D^{-1/2}.

    edge_index: int32 [2, E], row 0 = source, row 1 = destination (PyG convention).
    Self-loops are only added to nodes that don't already have one
    (matches PyG's add_remaining_self_loops used by gcn_norm).
    """
    src, dst = edge_index[0], edge_index[1]
    a = jnp.zeros((num_nodes, num_nodes), jnp.float32).at[dst, src].add(1.0)
    diag = jnp.diagonal(a)
    a = a + jnp.diag(jnp.where(diag > 0.0, 0.0, 1.0))
    deg = a.sum(axis=1)                              # in-degree incl. self-loop
    d_inv_sqrt = jnp.where(deg > 0.0, jax.lax.rsqrt(deg), 0.0)
    return d_inv_sqrt[:, None] * a * d_inv_sqrt[None, :]


def build_pool_matrix(batch, num_graphs, num_nodes):
    """[G, N] row-normalized one-hot matrix so that P @ X = global_mean_pool(X)."""
    onehot = (batch[None, :] == jnp.arange(num_graphs)[:, None]).astype(jnp.float32)
    counts = onehot.sum(axis=1, keepdims=True)
    return onehot / jnp.maximum(counts, 1.0)


def init_gcn_params(key, in_channels, hidden_channels):
    """Deterministic glorot-ish weights and zero biases for the 5 GCNConv layers."""
    dims = [
        (in_channels, hidden_channels),
        (hidden_channels, hidden_channels * 2),
        (hidden_channels * 2, hidden_channels * 8),
        (hidden_channels * 8, hidden_channels * 32),
        (hidden_channels * 32, hidden_channels * 64),
    ]
    params = []
    for (c_in, c_out) in dims:
        key, sub = jax.random.split(key)
        scale = jnp.sqrt(6.0 / (c_in + c_out))
        w = jax.random.uniform(sub, (c_in, c_out), jnp.float32, -scale, scale)
        b = jnp.zeros((c_out,), jnp.float32)
        params.append((w, b))
    return params


def gcn_forward(x, edge_index, batch, params, num_graphs):
    n, c_in = x.shape
    n_pad = max(8, _round_up(n, 8))

    adj = build_norm_adj(edge_index, n)
    pool = build_pool_matrix(batch, num_graphs, n)

    # Pad node dim (zeros = isolated phantom nodes, excluded from pooling) and
    # channel dims (zero weight rows/cols keep padded channels exactly zero),
    # and cast MXU operands to bf16.
    adj_p = jnp.pad(adj, ((0, n_pad - n), (0, n_pad - n))).astype(jnp.bfloat16)
    pool_p = jnp.pad(pool, ((0, 0), (0, n_pad - n))).astype(jnp.bfloat16)

    c_in_pad = _round_up(c_in, 128)
    x_p = jnp.pad(x, ((0, n_pad - n), (0, c_in_pad - c_in))).astype(jnp.bfloat16)

    padded_params = []
    prev_pad = c_in_pad
    for (w, b) in params:
        c_i, c_o = w.shape
        c_o_pad = _round_up(c_o, 128)
        w_p = jnp.pad(w, ((0, prev_pad - c_i), (0, c_o_pad - c_o))).astype(jnp.bfloat16)
        b_p = jnp.pad(b, (0, c_o_pad - c_o)).reshape(1, c_o_pad).astype(jnp.float32)
        padded_params.append((w_p, b_p))
        prev_pad = c_o_pad

    out_pad = gcn_fused(adj_p, pool_p, x_p, padded_params)   # [G, c_final_pad] f32
    c_final = params[-1][0].shape[1]
    return out_pad[:, :c_final]


# --------------------------------- main --------------------------------------

if __name__ == "__main__":
    key = jax.random.PRNGKey(0)

    num_nodes = 16
    num_edges = 32
    num_graphs = 2
    in_channels = 4
    hidden_channels = 4   # -> layer widths 4, 8, 32, 128, 256

    k_x, k_e, k_p = jax.random.split(key, 3)
    x = jax.random.normal(k_x, (num_nodes, in_channels), jnp.float32)
    edge_index = jax.random.randint(k_e, (2, num_edges), 0, num_nodes, jnp.int32)
    # first 8 nodes -> graph 0, last 8 nodes -> graph 1
    batch = jnp.concatenate([jnp.zeros(8, jnp.int32), jnp.ones(8, jnp.int32)])

    params = init_gcn_params(k_p, in_channels, hidden_channels)

    out = gcn_forward(x, edge_index, batch, params, num_graphs)
    out = jax.block_until_ready(out)

    assert out.shape == (num_graphs, hidden_channels * 64)
    assert jnp.all(jnp.isfinite(out))
    print("KERNEL_OK")
</pallas_src>

<mosaic_0001>
module attributes {stable_mosaic.version = 11 : i64} {
  func.func @_gcn_fused_kernel(%arg0: memref<16x16xbf16, #tpu.memory_space<vmem>>, %arg1: memref<2x16xbf16, #tpu.memory_space<vmem>>, %arg2: memref<16x128xbf16, #tpu.memory_space<vmem>>, %arg3: memref<128x128xbf16, #tpu.memory_space<vmem>>, %arg4: memref<1x128xf32, #tpu.memory_space<vmem>>, %arg5: memref<128x128xbf16, #tpu.memory_space<vmem>>, %arg6: memref<1x128xf32, #tpu.memory_space<vmem>>, %arg7: memref<128x128xbf16, #tpu.memory_space<vmem>>, %arg8: memref<1x128xf32, #tpu.memory_space<vmem>>, %arg9: memref<128x128xbf16, #tpu.memory_space<vmem>>, %arg10: memref<1x128xf32, #tpu.memory_space<vmem>>, %arg11: memref<128x256xbf16, #tpu.memory_space<vmem>>, %arg12: memref<1x256xf32, #tpu.memory_space<vmem>>, %arg13: memref<2x256xf32, #tpu.memory_space<vmem>>) attributes {dimension_semantics = [], scalar_prefetch = 0 : i64, scratch_operands = 0 : i64, tpu.core_type = #tpu.core_type<tc>} {
    %c0 = arith.constant 0 : index
    %c0_0 = arith.constant 0 : index
    %0 = vector.load %arg0[%c0, %c0_0] : memref<16x16xbf16, #tpu.memory_space<vmem>>, vector<16x16xbf16>
    %c0_1 = arith.constant 0 : index
    %c0_2 = arith.constant 0 : index
    %1 = vector.load %arg2[%c0_1, %c0_2] : memref<16x128xbf16, #tpu.memory_space<vmem>>, vector<16x128xbf16>
    %cst = arith.constant dense<0.000000e+00> : vector<16x128xf32>
    %2 = tpu.matmul %0, %1, %cst {dimension_numbers = #tpu.dot_dimension_numbers<[1], [0], [0], [1], [0, 0, 1, 1], [], []>} : vector<16x16xbf16>, vector<16x128xbf16>, vector<16x128xf32> -> vector<16x128xf32>
    %3 = arith.truncf %2 : vector<16x128xf32> to vector<16x128xbf16>
    %c0_3 = arith.constant 0 : index
    %c0_4 = arith.constant 0 : index
    %4 = vector.load %arg3[%c0_3, %c0_4] : memref<128x128xbf16, #tpu.memory_space<vmem>>, vector<128x128xbf16>
    %cst_5 = arith.constant dense<0.000000e+00> : vector<16x128xf32>
    %5 = tpu.matmul %3, %4, %cst_5 {dimension_numbers = #tpu.dot_dimension_numbers<[1], [0], [0], [1], [0, 0, 1, 1], [], []>} : vector<16x128xbf16>, vector<128x128xbf16>, vector<16x128xf32> -> vector<16x128xf32>
    %c0_6 = arith.constant 0 : index
    %c0_7 = arith.constant 0 : index
    %6 = vector.load %arg4[%c0_6, %c0_7] : memref<1x128xf32, #tpu.memory_space<vmem>>, vector<1x128xf32>
    %7 = vector.broadcast %6 : vector<1x128xf32> to vector<16x128xf32>
    %8 = arith.addf %5, %7 : vector<16x128xf32>
    %cst_8 = arith.constant 0.000000e+00 : f32
    %9 = vector.broadcast %cst_8 : f32 to vector<16x128xf32>
    %10 = arith.maximumf %8, %9 : vector<16x128xf32>
    %11 = arith.truncf %10 : vector<16x128xf32> to vector<16x128xbf16>
    %cst_9 = arith.constant dense<0.000000e+00> : vector<16x128xf32>
    %12 = tpu.matmul %0, %11, %cst_9 {dimension_numbers = #tpu.dot_dimension_numbers<[1], [0], [0], [1], [0, 0, 1, 1], [], []>} : vector<16x16xbf16>, vector<16x128xbf16>, vector<16x128xf32> -> vector<16x128xf32>
    %13 = arith.truncf %12 : vector<16x128xf32> to vector<16x128xbf16>
    %c0_10 = arith.constant 0 : index
    %c0_11 = arith.constant 0 : index
    %14 = vector.load %arg5[%c0_10, %c0_11] : memref<128x128xbf16, #tpu.memory_space<vmem>>, vector<128x128xbf16>
    %cst_12 = arith.constant dense<0.000000e+00> : vector<16x128xf32>
    %15 = tpu.matmul %13, %14, %cst_12 {dimension_numbers = #tpu.dot_dimension_numbers<[1], [0], [0], [1], [0, 0, 1, 1], [], []>} : vector<16x128xbf16>, vector<128x128xbf16>, vector<16x128xf32> -> vector<16x128xf32>
    %c0_13 = arith.constant 0 : index
    %c0_14 = arith.constant 0 : index
    %16 = vector.load %arg6[%c0_13, %c0_14] : memref<1x128xf32, #tpu.memory_space<vmem>>, vector<1x128xf32>
    %17 = vector.broadcast %16 : vector<1x128xf32> to vector<16x128xf32>
    %18 = arith.addf %15, %17 : vector<16x128xf32>
    %cst_15 = arith.constant 0.000000e+00 : f32
    %19 = vector.broadcast %cst_15 : f32 to vector<16x128xf32>
    %20 = arith.maximumf %18, %19 : vector<16x128xf32>
    %21 = arith.truncf %20 : vector<16x128xf32> to vector<16x128xbf16>
    %cst_16 = arith.constant dense<0.000000e+00> : vector<16x128xf32>
    %22 = tpu.matmul %0, %21, %cst_16 {dimension_numbers = #tpu.dot_dimension_numbers<[1], [0], [0], [1], [0, 0, 1, 1], [], []>} : vector<16x16xbf16>, vector<16x128xbf16>, vector<16x128xf32> -> vector<16x128xf32>
    %23 = arith.truncf %22 : vector<16x128xf32> to vector<16x128xbf16>
    %c0_17 = arith.constant 0 : index
    %c0_18 = arith.constant 0 : index
    %24 = vector.load %arg7[%c0_17, %c0_18] : memref<128x128xbf16, #tpu.memory_space<vmem>>, vector<128x128xbf16>
    %cst_19 = arith.constant dense<0.000000e+00> : vector<16x128xf32>
    %25 = tpu.matmul %23, %24, %cst_19 {dimension_numbers = #tpu.dot_dimension_numbers<[1], [0], [0], [1], [0, 0, 1, 1], [], []>} : vector<16x128xbf16>, vector<128x128xbf16>, vector<16x128xf32> -> vector<16x128xf32>
    %c0_20 = arith.constant 0 : index
    %c0_21 = arith.constant 0 : index
    %26 = vector.load %arg8[%c0_20, %c0_21] : memref<1x128xf32, #tpu.memory_space<vmem>>, vector<1x128xf32>
    %27 = vector.broadcast %26 : vector<1x128xf32> to vector<16x128xf32>
    %28 = arith.addf %25, %27 : vector<16x128xf32>
    %cst_22 = arith.constant 0.000000e+00 : f32
    %29 = vector.broadcast %cst_22 : f32 to vector<16x128xf32>
    %30 = arith.maximumf %28, %29 : vector<16x128xf32>
    %31 = arith.truncf %30 : vector<16x128xf32> to vector<16x128xbf16>
    %cst_23 = arith.constant dense<0.000000e+00> : vector<16x128xf32>
    %32 = tpu.matmul %0, %31, %cst_23 {dimension_numbers = #tpu.dot_dimension_numbers<[1], [0], [0], [1], [0, 0, 1, 1], [], []>} : vector<16x16xbf16>, vector<16x128xbf16>, vector<16x128xf32> -> vector<16x128xf32>
    %33 = arith.truncf %32 : vector<16x128xf32> to vector<16x128xbf16>
    %c0_24 = arith.constant 0 : index
    %c0_25 = arith.constant 0 : index
    %34 = vector.load %arg9[%c0_24, %c0_25] : memref<128x128xbf16, #tpu.memory_space<vmem>>, vector<128x128xbf16>
    %cst_26 = arith.constant dense<0.000000e+00> : vector<16x128xf32>
    %35 = tpu.matmul %33, %34, %cst_26 {dimension_numbers = #tpu.dot_dimension_numbers<[1], [0], [0], [1], [0, 0, 1, 1], [], []>} : vector<16x128xbf16>, vector<128x128xbf16>, vector<16x128xf32> -> vector<16x128xf32>
    %c0_27 = arith.constant 0 : index
    %c0_28 = arith.constant 0 : index
    %36 = vector.load %arg10[%c0_27, %c0_28] : memref<1x128xf32, #tpu.memory_space<vmem>>, vector<1x128xf32>
    %37 = vector.broadcast %36 : vector<1x128xf32> to vector<16x128xf32>
    %38 = arith.addf %35, %37 : vector<16x128xf32>
    %cst_29 = arith.constant 0.000000e+00 : f32
    %39 = vector.broadcast %cst_29 : f32 to vector<16x128xf32>
    %40 = arith.maximumf %38, %39 : vector<16x128xf32>
    %41 = arith.truncf %40 : vector<16x128xf32> to vector<16x128xbf16>
    %cst_30 = arith.constant dense<0.000000e+00> : vector<16x128xf32>
    %42 = tpu.matmul %0, %41, %cst_30 {dimension_numbers = #tpu.dot_dimension_numbers<[1], [0], [0], [1], [0, 0, 1, 1], [], []>} : vector<16x16xbf16>, vector<16x128xbf16>, vector<16x128xf32> -> vector<16x128xf32>
    %43 = arith.truncf %42 : vector<16x128xf32> to vector<16x128xbf16>
    %c0_31 = arith.constant 0 : index
    %c0_32 = arith.constant 0 : index
    %44 = vector.load %arg11[%c0_31, %c0_32] : memref<128x256xbf16, #tpu.memory_space<vmem>>, vector<128x256xbf16>
    %cst_33 = arith.constant dense<0.000000e+00> : vector<16x256xf32>
    %45 = tpu.matmul %43, %44, %cst_33 {dimension_numbers = #tpu.dot_dimension_numbers<[1], [0], [0], [1], [0, 0, 1, 1], [], []>} : vector<16x128xbf16>, vector<128x256xbf16>, vector<16x256xf32> -> vector<16x256xf32>
    %c0_34 = arith.constant 0 : index
    %c0_35 = arith.constant 0 : index
    %46 = vector.load %arg12[%c0_34, %c0_35] : memref<1x256xf32, #tpu.memory_space<vmem>>, vector<1x256xf32>
    %47 = vector.broadcast %46 : vector<1x256xf32> to vector<16x256xf32>
    %48 = arith.addf %45, %47 : vector<16x256xf32>
    %cst_36 = arith.constant 0.000000e+00 : f32
    %49 = vector.broadcast %cst_36 : f32 to vector<16x256xf32>
    %50 = arith.maximumf %48, %49 : vector<16x256xf32>
    %51 = arith.truncf %50 : vector<16x256xf32> to vector<16x256xbf16>
    %c0_37 = arith.constant 0 : index
    %c0_38 = arith.constant 0 : index
    %52 = vector.load %arg1[%c0_37, %c0_38] : memref<2x16xbf16, #tpu.memory_space<vmem>>, vector<2x16xbf16>
    %cst_39 = arith.constant dense<0.000000e+00> : vector<2x256xf32>
    %53 = tpu.matmul %52, %51, %cst_39 {dimension_numbers = #tpu.dot_dimension_numbers<[1], [0], [0], [1], [0, 0, 1, 1], [], []>} : vector<2x16xbf16>, vector<16x256xbf16>, vector<2x256xf32> -> vector<2x256xf32>
    %c0_40 = arith.constant 0 : index
    %c0_41 = arith.constant 0 : index
    %54 = vector.load %arg13[%c0_40, %c0_41] : memref<2x256xf32, #tpu.memory_space<vmem>>, vector<2x256xf32>
    tpu.vector_store %arg13[%c0_40, %c0_41], %53 {strides = array<i32>} : memref<2x256xf32, #tpu.memory_space<vmem>>, vector<2x256xf32>,
    return
  }
}

</mosaic_0001>

<bundles_post_ra>
// kernel: tpu_custom_call.1
= control target key start
LH: loop header
LB: loop body
LE: loop exit
PB: predicated region body
PF: predicated region fallthrough
CT: control target
= control target key end

     0   :  { %18 = vsyncpa [#allocation3], 0  ;;  %s1456_s0 = inlined_call_operand.hbm [shape: bf16[16,16], index: 0, kind: input, shape index: {}]   ;;  %s1457_s1 = inlined_call_operand.hbm [shape: bf16[2,16], index: 1, kind: input, shape index: {}]   ;;  %s1458_s2 = inlined_call_operand.hbm [shape: bf16[16,128], index: 2, kind: input, shape index: {}]   ;;  %s1459_s3 = inlined_call_operand.hbm [shape: bf16[128,128], index: 3, kind: input, shape index: {}]   ;;  %s1460_s4 = inlined_call_operand.vmem [shape: f32[1,128], index: 4, kind: input, shape index: {}]   ;;  %s1461_s5 = inlined_call_operand.hbm [shape: bf16[128,128], index: 5, kind: input, shape index: {}]   ;;  %s1462_s6 = inlined_call_operand.vmem [shape: f32[1,128], index: 6, kind: input, shape index: {}]   ;;  %s1463_s7 = inlined_call_operand.hbm [shape: bf16[128,128], index: 7, kind: input, shape index: {}]   ;;  %s1464_s8 = inlined_call_operand.vmem [shape: f32[1,128], index: 8, kind: input, shape index: {}]   ;;  %s1465_s9 = inlined_call_operand.hbm [shape: bf16[128,128], index: 9, kind: input, shape index: {}]   ;;  %s1466_s10 = inlined_call_operand.vmem [shape: f32[1,128], index: 10, kind: input, shape index: {}]   ;;  %s1467_s11 = inlined_call_operand.hbm [shape: bf16[128,256], index: 11, kind: input, shape index: {}]   ;;  %s1468_s12 = inlined_call_operand.vmem [shape: f32[1,256], index: 12, kind: input, shape index: {}]   ;;  %s1469_s13 = inlined_call_operand.hbm [shape: f32[2,256], index: 13, kind: output, shape index: {}]  }
   0x1   :  { %19 = vsyncpa [#allocation6], 0 }
   0x2   :  { %20 = vsyncpa [#allocation9], 0 }
   0x3   :  { %21 = vsyncpa [#allocation12], 0 }
   0x4   :  { %22 = vsyncpa [#allocation15], 0  ;;  %s42_s27 = sshll.u32 %s1457_s1, 4  ;;  %s43_s27 = int_to_ptr.hbm [resolvable:$true] %s42_s27 }
   0x5   :  { %23 = vsyncpa [#allocation4], 0  ;;  %s1299_s28 = smov [#allocation5]   ;;  %s65_s15 = sshll.u32 %s1459_s3, 4  ;;  %s66_s15 = int_to_ptr.hbm [resolvable:$true] %s65_s15 }
   0x6   :  { %s44_s29 = sshll.u32 %s1299_s28, 4  ;;  %s1300_s16 = smov [#allocation8]   ;;  %s45_s29 = int_to_ptr.vmem [resolvable:$true] %s44_s29 }
   0x7   :  { %47 = dma.hbm_to_vmem [thread:$0]  %s43_s27, 16, %s45_s29, [#allocation6]  }
   0x8   :  { %s67_s17 = sshll.u32 %s1300_s16, 4  ;;  %s95_s20 = sshll.u32 %s1463_s7, 4  ;;  %s68_s17 = int_to_ptr.vmem [resolvable:$true] %s67_s17  ;;  %s96_s20 = int_to_ptr.hbm [resolvable:$true] %s95_s20 }
   0x9   :  { %s1301_s1 = smov 64   ;;  %s1302_s21 = smov 4  }
   0xa   :  { %73 = dma.hbm_to_vmem [thread:$0]  %s66_s15, 1024, %s68_s17, [#allocation9], %s1301_s1, %s1301_s1, %s1302_s21  }
   0xb   :  { %s28_s24 = sshll.u32 %s1456_s0, 4  ;;  %s1303_s3 = smov [#allocation11]   ;;  %s29_s24 = int_to_ptr.hbm [resolvable:$true] %s28_s24 }
   0xc   :  { %s97_s25 = sshll.u32 %s1303_s3, 4  ;;  %s1304_s7 = smov [#allocation2]   ;;  %s98_s25 = int_to_ptr.vmem [resolvable:$true] %s97_s25 }
   0xd   :  { %103 = dma.hbm_to_vmem [thread:$0]  %s96_s20, 1024, %s98_s25, [#allocation12], %s1301_s1, %s1301_s1, %s1302_s21  }
   0xe   :  { %s30_s26 = sshll.u32 %s1304_s7, 4  ;;  %s52_s29 = sshll.u32 %s1458_s2, 4  ;;  %s31_s26 = int_to_ptr.vmem [resolvable:$true] %s30_s26  ;;  %s53_s29 = int_to_ptr.hbm [resolvable:$true] %s52_s29 }
   0xf   :  { %36 = dma.hbm_to_vmem [thread:$0]  %s29_s24, 128, %s31_s26, [#allocation3], %s1301_s1, %s1301_s1, %s1302_s21  }
  0x10   :  { %s80_s14 = sshll.u32 %s1461_s5, 4  ;;  %s1305_s15 = smov [#allocation7]   ;;  %s81_s14 = int_to_ptr.hbm [resolvable:$true] %s80_s14 }
  0x11   :  { %s54_s16 = sshll.u32 %s1305_s15, 4  ;;  %s1306_s17 = smov [#allocation10]   ;;  %s55_s16 = int_to_ptr.vmem [resolvable:$true] %s54_s16 }
  0x12   :  { %60 = dma.hbm_to_vmem [thread:$0]  %s53_s29, 128, %s55_s16, [#allocation6], %s1301_s1, %s1301_s1, %s1302_s21  }
  0x13   :  { %s82_s2 = sshll.u32 %s1306_s17, 4  ;;  %s110_s20 = sshll.u32 %s1465_s9, 4  ;;  %s83_s2 = int_to_ptr.vmem [resolvable:$true] %s82_s2  ;;  %s111_s20 = int_to_ptr.hbm [resolvable:$true] %s110_s20 }
  0x14   :  { %88 = dma.hbm_to_vmem [thread:$0]  %s81_s14, 1024, %s83_s2, [#allocation9], %s1301_s1, %s1301_s1, %s1302_s21  }
  0x15   :  { %s125_s23 = sshll.u32 %s1467_s11, 4  ;;  %s1307_s24 = smov [#allocation13]   ;;  %s126_s23 = int_to_ptr.hbm [resolvable:$true] %s125_s23 }
  0x16   :  { %s112_s3 = sshll.u32 %s1307_s24, 4  ;;  %s1308_s25 = smov [#allocation14]   ;;  %s113_s3 = int_to_ptr.vmem [resolvable:$true] %s112_s3 }
  0x17   :  { %118 = dma.hbm_to_vmem [thread:$0]  %s111_s20, 1024, %s113_s3, [#allocation12], %s1301_s1, %s1301_s1, %s1302_s21  }
  0x18   :  { %s127_s9 = sshll.u32 %s1308_s25, 4  ;;  %s1309_s7 = smov 128   ;;  %s128_s9 = int_to_ptr.vmem [resolvable:$true] %s127_s9 }
  0x19   :  { %s1310_s26 = smov 8  }
  0x1a   :  { %133 = dma.hbm_to_vmem [thread:$0]  %s126_s23, 2048, %s128_s9, [#allocation15], %s1309_s7, %s1309_s7, %s1310_s26  }
  0x1b   :  { %1287 = dma.done.wait [#allocation3], 128  }
  0x1c   :  { %1288 = vsyncadd [#allocation3], 4294967168 }
  0x1d   :  { %1289 = dma.done.wait [#allocation6], 144  }
  0x1e   :  { %1290 = vsyncadd [#allocation6], 4294967152 }
  0x1f   :  { %1291 = dma.done.wait [#allocation9], 2048  }
  0x20   :  { %1292 = vsyncadd [#allocation9], 4294965248 }
  0x21   :  { %1293 = dma.done.wait [#allocation12], 2048  }
  0x22   :  { %1294 = vsyncadd [#allocation12], 4294965248 }
  0x23   :  { %1295 = dma.done.wait [#allocation15], 2048  }
  0x24   :  { %1296 = vsyncadd [#allocation15], 4294965248  ;;  %v1005_v0 = vld [vmem:[#allocation7] sm:$0xff]  ;;  %v1424_v2 = vld [vmem:[#allocation2] sm:$0xff]  ;;  %vm184_vm0 = vcmask 130048   ;;  %s783_s15 = sshll.u32 %s1469_s13, 4  ;;  %s784_s15 = int_to_ptr.hbm [resolvable:$true] %s783_s15 }
  0x25   :  { %v1013_v1 = vld [vmem:[#allocation8 + $0x38] sm:$0xff]  ;;  %195 = vmatpush.bf16.msra.mxu0 %v1005_v0  ;;  %v1012_v3 = vld [vmem:[#allocation8 + $0x30] sm:$0xff]  ;;  %v1011_v4 = vld [vmem:[#allocation8 + $0x28] sm:$0xff]  ;;  %vm772_vm1 = vcmask 1041408  }
  0x26   :  { %271 = vmatpush.bf16.msra.mxu1 %v1013_v1  ;;  %v1010_v5 = vld [vmem:[#allocation8 + $0x20] sm:$0xff]  ;;  %v1009_v6 = vld [vmem:[#allocation8 + $0x18] sm:$0xff]  ;;  %v1008_v7 = vld [vmem:[#allocation8 + $0x10] sm:$0xff] }
  0x27   :  { %v1007_v8 = vld [vmem:[#allocation8 + $0x8] sm:$0xff]  ;;  %v1006_v9 = vld [vmem:[#allocation8] sm:$0xff]  ;;  %v1021_v13 = vld [vmem:[#allocation10 + $0x38] sm:$0xff] }
  0x28   :  { %805 = vmatmul.msk.bf16.vlgmr.msra.gmra.mxu0 %vm184_vm0, %v1424_v2  ;;  %371 = vmatpush.bf16.msra.mxu3 %v1021_v13  ;;  %v1020_v14 = vld [vmem:[#allocation10 + $0x30] sm:$0xff]  ;;  %v1019_v15 = vld [vmem:[#allocation10 + $0x28] sm:$0xff]  ;;  %v1018_v16 = vld [vmem:[#allocation10 + $0x20] sm:$0xff] }
  0x29   :  { %v1017_v18 = vld [vmem:[#allocation10 + $0x18] sm:$0xff]  ;;  %v1067_v19 = vld [vmem:[%s1460_s4] ss:$0 sm:$0xff]  ;;  %v1016_v26 = vld [vmem:[#allocation10 + $0x10] sm:$0xff] }
  0x2a   :  { %272 = vmatpush.bf16.msra.mxu1 %v1012_v3  ;;  %v1015_v27 = vld [vmem:[#allocation10 + $0x8] sm:$0xff]  ;;  %v1014_v28 = vld [vmem:[#allocation10] sm:$0xff]  ;;  %v1029_v32 = vld [vmem:[#allocation11 + $0x38] sm:$0xff] }
  0x2b   :  { %v1028_v33 = vld [vmem:[#allocation11 + $0x30] sm:$0xff]  ;;  %v1027_v34 = vld [vmem:[#allocation11 + $0x28] sm:$0xff]  ;;  %v1026_v35 = vld [vmem:[#allocation11 + $0x20] sm:$0xff] }
  0x2c   :  { %372 = vmatpush.bf16.msra.mxu3 %v1020_v14  ;;  %v1025_v37 = vld [vmem:[#allocation11 + $0x18] sm:$0xff]  ;;  %v1068_v38 = vld [vmem:[%s1462_s6] ss:$0 sm:$0xff]  ;;  %v1024_v45 = vld [vmem:[#allocation11 + $0x10] sm:$0xff] }
  0x2d   :  { %v1023_v46 = vld [vmem:[#allocation11 + $0x8] sm:$0xff]  ;;  %v1022_v47 = vld [vmem:[#allocation11] sm:$0xff]  ;;  %v1037_v51 = vld [vmem:[#allocation13 + $0x38] sm:$0xff] }
  0x2e   :  { %273 = vmatpush.bf16.msra.mxu1 %v1011_v4  ;;  %v1036_v52 = vld [vmem:[#allocation13 + $0x30] sm:$0xff]  ;;  %v1035_v53 = vld [vmem:[#allocation13 + $0x28] sm:$0xff]  ;;  %v1034_v54 = vld [vmem:[#allocation13 + $0x20] sm:$0xff] }
  0x2f   :  { %v1033_v56 = vld [vmem:[#allocation13 + $0x18] sm:$0xff]  ;;  %v1069_v57 = vld [vmem:[%s1464_s8] ss:$0 sm:$0xff]  ;;  %v1032_v0 = vld [vmem:[#allocation13 + $0x10] sm:$0xff] }
  0x30   :  { %373 = vmatpush.bf16.msra.mxu3 %v1019_v15  ;;  %v1031_v1 = vld [vmem:[#allocation13 + $0x8] sm:$0xff]  ;;  %v1030_v3 = vld [vmem:[#allocation13] sm:$0xff] }
  0x31   :  { %v1051_v13 = vld [vmem:[#allocation14 + $0x64] sm:$0xf0]  ;;  %v1050_v15 = vld [vmem:[#allocation14 + $0x64] sm:$0xf] }
  0x32   :  { %274 = vmatpush.bf16.msra.mxu1 %v1010_v5 }
  0x34   :  { %374 = vmatpush.bf16.msra.mxu3 %v1018_v16  ;;  %v990_v16 = vld [vmem:[#allocation14 + $0x68] sm:$0xf0] }
  0x36   :  { %275 = vmatpush.bf16.msra.mxu1 %v1009_v6 }
  0x38   :  { %375 = vmatpush.bf16.msra.mxu3 %v1017_v18  ;;  %v993_v18 = vor.u32 %v1050_v15, %v990_v16  ;;  %v739_v16 = vld [vmem:[#allocation5] sm:$0x1] }
  0x3a   :  { %276 = vmatpush.bf16.msra.mxu1 %v1008_v7  ;;  %v996_v7 = vld [vmem:[#allocation14 + $0x70] sm:$0xf] }
  0x3c   :  { %376 = vmatpush.bf16.msra.mxu3 %v1016_v26  ;;  %v1047_v26 = vld [vmem:[#allocation14 + $0x44] sm:$0xf0] }
  0x3e   :  { %277 = vmatpush.bf16.msra.mxu1 %v1007_v8  ;;  %v1053_v8 = vld [vmem:[#allocation14 + $0x74] sm:$0xf0] }
  0x40   :  { %377 = vmatpush.bf16.msra.mxu3 %v1015_v27  ;;  %v1046_v27 = vld [vmem:[#allocation14 + $0x44] sm:$0xf] }
  0x42   :  { %278 = vmatpush.bf16.msra.mxu1 %v1006_v9  ;;  %v1052_v9 = vld [vmem:[#allocation14 + $0x74] sm:$0xf] }
  0x44   :  { %378 = vmatpush.bf16.msra.mxu3 %v1014_v28  ;;  %v974_v28 = vld [vmem:[#allocation14 + $0x48] sm:$0xf0] }
  0x46   :  { %571 = vmatpush.bf16.msrb.mxu1 %v1037_v51  ;;  %v948_v51 = vld [vmem:[#allocation14 + $0x10] sm:$0xf] }
  0x4a   :  { %572 = vmatpush.bf16.msrb.mxu1 %v1036_v52  ;;  %v1041_v52 = vld [vmem:[#allocation14 + $0x14] sm:$0xf0] }
  0x4e   :  { %573 = vmatpush.bf16.msrb.mxu1 %v1035_v53  ;;  %v1040_v53 = vld [vmem:[#allocation14 + $0x14] sm:$0xf] }
  0x52   :  { %574 = vmatpush.bf16.msrb.mxu1 %v1034_v54  ;;  %v949_v54 = vor.u32 %v1041_v52, %v948_v51 }
  0x56   :  { %575 = vmatpush.bf16.msrb.mxu1 %v1033_v56 }
  0x5a   :  { %576 = vmatpush.bf16.msrb.mxu1 %v1032_v0 }
  0x5e   :  { %577 = vmatpush.bf16.msrb.mxu1 %v1031_v1  ;;  %v619_v1 = vld [vmem:[%s1468_s12] sm:$0x3]  ;;  %s1311_s12 = smov [#allocation16]  }
  0x5f   :  { %s781_s0 = sshll.u32 %s1311_s12, 4  ;;  %s782_s0 = int_to_ptr.vmem [resolvable:$true] %s781_s0 }
  0x62   :  { %578 = vmatpush.bf16.msrb.mxu1 %v1030_v3 }
  0xa5   :  { %v197_v10 = vpop.f32.mrf.mxu0 }
  0xad   :  { %v199_v11 = vpop.f32.mrf.mxu0 }
  0xae   :  { %v202_v12 = vpack.c.bf16 %v199_v11, %v197_v10  ;;  %v997_v10 = vor.u32 %v1053_v8, %v996_v7  ;;  %v998_v11 = vld [vmem:[#allocation14 + $0x78] sm:$0xf0]  ;;  %v622_v8 = vperm.slane %v619_v1, 1 }
  0xaf   :  { %v1001_v14 = vor.u32 %v1052_v9, %v998_v11 }
  0xb0   :  { %279 = vmatmul.bf16.vlgmr.msra.gmra.mxu1 %v202_v12  ;;  %v988_v12 = vld [vmem:[#allocation14 + $0x60] sm:$0xf] }
 0x12d   :  { %v280_v17 = vpop.f32.mrf.mxu1 }
 0x12e   :  { %v281_v20 = vadd.f32 %v1067_v19, %v280_v17  ;;  %v989_v17 = vor.u32 %v1051_v13, %v988_v12 }
 0x130   :  { %v285_v23 = vmax.f32 %v281_v20, 0.0  ;;  %v1049_v20 = vld [vmem:[#allocation14 + $0x54] sm:$0xf0] }
 0x135   :  { %v282_v21 = vpop.f32.mrf.mxu1 }
 0x136   :  { %v283_v22 = vadd.f32 %v1067_v19, %v282_v21  ;;  %v980_v19 = vld [vmem:[#allocation14 + $0x50] sm:$0xf]  ;;  %v1048_v21 = vld [vmem:[#allocation14 + $0x54] sm:$0xf] }
 0x138   :  { %v286_v24 = vmax.f32 %v283_v22, 0.0  ;;  %v982_v22 = vld [vmem:[#allocation14 + $0x58] sm:$0xf0] }
 0x13a   :  { %v287_v25 = vpack.c.bf16 %v286_v24, %v285_v23  ;;  %v981_v23 = vor.u32 %v1049_v20, %v980_v19  ;;  %v985_v24 = vor.u32 %v1048_v21, %v982_v22 }
 0x13c   :  { %295 = vmatpush.bf16.msra.mxu2 %v287_v25  ;;  %v972_v25 = vld [vmem:[#allocation14 + $0x40] sm:$0xf] }
 0x13f   :  { %838 = vmatmul.msk.bf16.vlgmr.msra.gmra.mxu2 %vm184_vm0, %v1424_v2 }
 0x140   :  { %471 = vmatpush.bf16.msrb.mxu2 %v1029_v32  ;;  %v1045_v32 = vld [vmem:[#allocation14 + $0x34] sm:$0xf0] }
 0x144   :  { %472 = vmatpush.bf16.msrb.mxu2 %v1028_v33  ;;  %v1044_v33 = vld [vmem:[#allocation14 + $0x34] sm:$0xf] }
 0x148   :  { %473 = vmatpush.bf16.msrb.mxu2 %v1027_v34  ;;  %v966_v34 = vld [vmem:[#allocation14 + $0x38] sm:$0xf0] }
 0x14c   :  { %474 = vmatpush.bf16.msrb.mxu2 %v1026_v35 }
 0x150   :  { %475 = vmatpush.bf16.msrb.mxu2 %v1025_v37  ;;  %v969_v37 = vor.u32 %v1044_v33, %v966_v34 }
 0x154   :  { %476 = vmatpush.bf16.msrb.mxu2 %v1024_v45  ;;  %v956_v45 = vld [vmem:[#allocation14 + $0x20] sm:$0xf] }
 0x158   :  { %477 = vmatpush.bf16.msrb.mxu2 %v1023_v46  ;;  %v1043_v46 = vld [vmem:[#allocation14 + $0x24] sm:$0xf0] }
 0x15c   :  { %478 = vmatpush.bf16.msrb.mxu2 %v1022_v47  ;;  %v1042_v47 = vld [vmem:[#allocation14 + $0x24] sm:$0xf] }
 0x160   :  { %719 = vmatpush.bf16.msra.mxu2 %v1001_v14 }
 0x164   :  { %720 = vmatpush.bf16.msra.mxu2 %v993_v18 }
 0x168   :  { %721 = vmatpush.bf16.msra.mxu2 %v985_v24 }
 0x1c2   :  { %v297_v29 = vpop.f32.mrf.mxu2 }
 0x1ca   :  { %v299_v30 = vpop.f32.mrf.mxu2 }
 0x1cb   :  { %v302_v31 = vpack.c.bf16 %v299_v30, %v297_v29  ;;  %v973_v29 = vor.u32 %v1047_v26, %v972_v25  ;;  %v977_v30 = vor.u32 %v1046_v27, %v974_v28 }
 0x1cd   :  { %379 = vmatmul.bf16.vlgmr.msra.gmra.mxu3 %v302_v31  ;;  %v964_v31 = vld [vmem:[#allocation14 + $0x30] sm:$0xf]  ;;  %722 = vmatpush.bf16.msra.mxu2 %v977_v30 }
 0x1d1   :  { %723 = vmatpush.bf16.msra.mxu2 %v969_v37 }
 0x250   :  { %v380_v36 = vpop.f32.mrf.mxu3 }
 0x251   :  { %v381_v39 = vadd.f32 %v1068_v38, %v380_v36  ;;  %v965_v36 = vor.u32 %v1045_v32, %v964_v31 }
 0x253   :  { %v385_v42 = vmax.f32 %v381_v39, 0.0 }
 0x258   :  { %v382_v40 = vpop.f32.mrf.mxu3 }
 0x259   :  { %v383_v41 = vadd.f32 %v1068_v38, %v382_v40  ;;  %v1070_v38 = vld [vmem:[%s1466_s10] ss:$0 sm:$0xff] }
 0x25b   :  { %v386_v43 = vmax.f32 %v383_v41, 0.0 }
 0x25d   :  { %v387_v44 = vpack.c.bf16 %v386_v43, %v385_v42 }
 0x25f   :  { %395 = vmatpush.bf16.msrb.mxu0 %v387_v44 }
 0x262   :  { %871 = vmatmul.msk.bf16.vlgmr.msrb.gmra.mxu0 %vm184_vm0, %v1424_v2 }
 0x2df   :  { %v397_v48 = vpop.f32.mrf.mxu0 }
 0x2e7   :  { %v399_v49 = vpop.f32.mrf.mxu0 }
 0x2e8   :  { %v402_v50 = vpack.c.bf16 %v399_v49, %v397_v48  ;;  %v957_v48 = vor.u32 %v1043_v46, %v956_v45  ;;  %v958_v49 = vld [vmem:[#allocation14 + $0x28] sm:$0xf0] }
 0x2ea   :  { %479 = vmatmul.bf16.vlgmr.msrb.gmra.mxu2 %v402_v50  ;;  %v961_v50 = vor.u32 %v1042_v47, %v958_v49 }
 0x2ec   :  { %724 = vmatpush.bf16.msra.mxu2 %v961_v50 }
 0x36d   :  { %v480_v55 = vpop.f32.mrf.mxu2 }
 0x36e   :  { %v481_v58 = vadd.f32 %v1069_v57, %v480_v55  ;;  %v950_v55 = vld [vmem:[#allocation14 + $0x18] sm:$0xf0] }
 0x36f   :  { %v953_v56 = vor.u32 %v1040_v53, %v950_v55 }
 0x370   :  { %v485_v61 = vmax.f32 %v481_v58, 0.0  ;;  %v1039_v58 = vld [vmem:[#allocation14 + $0x4] sm:$0xf0] }
 0x371   :  { %725 = vmatpush.bf16.msra.mxu2 %v953_v56 }
 0x375   :  { %v482_v59 = vpop.f32.mrf.mxu2 }
 0x376   :  { %v483_v60 = vadd.f32 %v1069_v57, %v482_v59  ;;  %v940_v57 = vld [vmem:[#allocation14] sm:$0xf]  ;;  %v1038_v59 = vld [vmem:[#allocation14 + $0x4] sm:$0xf] }
 0x378   :  { %v486_v62 = vmax.f32 %v483_v60, 0.0  ;;  %v942_v60 = vld [vmem:[#allocation14 + $0x8] sm:$0xf0] }
 0x37a   :  { %v487_v63 = vpack.c.bf16 %v486_v62, %v485_v61  ;;  %v945_v61 = vor.u32 %v1038_v59, %v942_v60 }
 0x37c   :  { %495 = vmatpush.bf16.msra.mxu0 %v487_v63  ;;  %726 = vmatpush.bf16.msra.mxu2 %v945_v61 }
 0x37f   :  { %904 = vmatmul.msk.bf16.vlgmr.msra.gmra.mxu0 %vm184_vm0, %v1424_v2 }
 0x380   :  { %705 = vmatpush.bf16.msrb.mxu0 %v997_v10 }
 0x384   :  { %706 = vmatpush.bf16.msrb.mxu0 %v989_v17 }
 0x388   :  { %707 = vmatpush.bf16.msrb.mxu0 %v981_v23 }
 0x38c   :  { %708 = vmatpush.bf16.msrb.mxu0 %v973_v29 }
 0x390   :  { %709 = vmatpush.bf16.msrb.mxu0 %v965_v36 }
 0x394   :  { %710 = vmatpush.bf16.msrb.mxu0 %v957_v48 }
 0x398   :  { %711 = vmatpush.bf16.msrb.mxu0 %v949_v54 }
 0x3fc   :  { %v497_v4 = vpop.f32.mrf.mxu0 }
 0x404   :  { %v499_v5 = vpop.f32.mrf.mxu0 }
 0x405   :  { %v502_v6 = vpack.c.bf16 %v499_v5, %v497_v4  ;;  %v621_v4 = vperm.slane %v619_v1, 0 }
 0x407   :  { %579 = vmatmul.bf16.vlgmr.msrb.gmra.mxu1 %v502_v6 }
 0x484   :  { %v580_v35 = vpop.f32.mrf.mxu1 }
 0x485   :  { %v581_v39 = vadd.f32 %v1070_v38, %v580_v35 }
 0x487   :  { %v585_v42 = vmax.f32 %v581_v39, 0.0 }
 0x48c   :  { %v582_v40 = vpop.f32.mrf.mxu1 }
 0x48d   :  { %v583_v41 = vadd.f32 %v1070_v38, %v582_v40 }
 0x48f   :  { %v586_v43 = vmax.f32 %v583_v41, 0.0 }
 0x491   :  { %v587_v44 = vpack.c.bf16 %v586_v43, %v585_v42 }
 0x493   :  { %595 = vmatpush.bf16.msrb.mxu3 %v587_v44 }
 0x496   :  { %937 = vmatmul.msk.bf16.vlgmr.msrb.gmra.mxu3 %vm184_vm0, %v1424_v2  ;;  %v941_v2 = vor.u32 %v1039_v58, %v940_v57 }
 0x498   :  { %712 = vmatpush.bf16.msrb.mxu0 %v941_v2 }
 0x519   :  { %v597_v62 = vpop.f32.mrf.mxu3 }
 0x521   :  { %v599_v63 = vpop.f32.mrf.mxu3 }
 0x522   :  { %v602_v0 = vpack.c.bf16 %v599_v63, %v597_v62 }
 0x524   :  { %713 = vmatmul.bf16.vlgmr.msrb.gmra.mxu0 %v602_v0  ;;  %727 = vmatmul.bf16.vlgmr.msra.gmra.mxu2 %v602_v0 }
 0x5a1   :  { %v714_v3 = vpop.f32.mrf.mxu0 }
 0x5a2   :  { %v715_v6 = vadd.f32 %v714_v3, %v621_v4 }
 0x5a4   :  { %v733_v10 = vmax.f32 %v715_v6, 0.0 }
 0x5a7   :  { %v728_v5 = vpop.f32.mrf.mxu2 }
 0x5a8   :  { %v729_v12 = vadd.f32 %v728_v5, %v622_v8 }
 0x5a9   :  { %v716_v7 = vpop.f32.mrf.mxu0 }
 0x5aa   :  { %v717_v9 = vadd.f32 %v716_v7, %v621_v4  ;;  %v734_v17 = vmax.f32 %v729_v12, 0.0 }
 0x5ac   :  { %v735_v11 = vmax.f32 %v717_v9, 0.0 }
 0x5ae   :  { %v737_v13 = vpack.c.bf16 %v735_v11, %v733_v10 }
 0x5af   :  { %v730_v14 = vpop.f32.mrf.mxu2 }
 0x5b0   :  { %v731_v15 = vadd.f32 %v730_v14, %v622_v8  ;;  %750 = vmatpush.bf16.msra.mxu3 %v737_v13 }
 0x5b2   :  { %v736_v18 = vmax.f32 %v731_v15, 0.0 }
 0x5b3   :  { %1002 = vmatmul.msk.bf16.vlgmr.msra.gmra.mxu3 %vm184_vm0, %v739_v16 }
 0x5b4   :  { %v738_v19 = vpack.c.bf16 %v736_v18, %v734_v17 }
 0x5b6   :  { %763 = vmatpush.bf16.msra.mxu1 %v738_v19 }
 0x5b9   :  { %1003 = vmatmul.msk.bf16.vlgmr.msra.gmra.mxu1 %vm184_vm0, %v739_v16 }
 0x636   :  { %v752_v20 = vpop.f32.mrf.mxu3  ;;  %v765_v21 = vpop.f32.mrf.mxu1 }
 0x637   :  { %v771_v22 = vrot.slane %v765_v21, 6 }
 0x639   :  { %v773_v23 = vsel %vm772_vm1, %v752_v20, %v771_v22 }
 0x63a   :  { %775 = vst [vmem:[#allocation16] sm:$0xf] %v773_v23 }
 0x63b   :  { %786 = dma.vmem_to_hbm [thread:$0]  %s782_s0, 64, %s784_s15, [#allocation4]  }
 0x63e   :  { %v754_v24 = vpop.f32.mrf.mxu3  ;;  %v767_v25 = vpop.f32.mrf.mxu1 }
 0x63f   :  { %1297 = dma.done.wait [#allocation4], 64  }
 0x640   :  { %1298 = vsyncadd [#allocation4], 4294967232 }
 0x641   :  { %791 = vsyncpa [#allocation3], 1 }
 0x642   :  { %792 = vsyncpa [#allocation6], 1 }
 0x643   :  { %793 = vsyncpa [#allocation9], 1 }
 0x644   :  { %794 = vsyncpa [#allocation12], 1 }
 0x645   :  { %795 = vsyncpa [#allocation15], 1 }
 0x646   :  { %796 = vsyncpa [#allocation4], 1 }

</bundles_post_ra>
